<compile_context>
chip_gen: v6e
topology: v6e:2x2x1
jax: 0.10.0
libtpu: 0.0.40
codegen_flags: <defaults>
</compile_context>

<pallas_src>
from functools import partial

import jax
import jax.numpy as jnp
from jax.experimental import pallas as pl
from jax.experimental.pallas import tpu as pltpu


def _vmem_capacity_bytes():
    """Per-core VMEM capacity; conservative fallback if the query fails."""
    try:
        return int(pltpu.get_tpu_info().vmem_capacity_bytes)
    except Exception:
        return 64 * 1024 * 1024  # v7x per-core VMEM (smallest of the three gens)


def _residual_block_kernel(x_cur_ref, x_la_ref, wd0_ref, wd1_ref, wr_ref, br_ref,
                           ws_ref, bs_ref, out_ref, skip_ref, xbuf_ref, *,
                           dilation, j0, mm_dtype, approx_recip):
    """One (batch, time-tile) grid step, everything in (channel, time) layout.

    x_cur_ref : (1, C_res, tile)  x[:, j*tile : (j+1)*tile]
    x_la_ref  : (1, C_res, LA)    look-ahead head starting at (j+1)*tile
    wd0/wd1   : (C_res, C_res)    dilated-conv taps 0 / 1
    wr, br    : (C_res, C_res), (C_res, 1)      1x1 conv_res weight / bias (f32 bias)
    ws, bs    : (C_skip, C_res), (C_skip, 1)    1x1 conv_skip weight / bias
    out_ref   : (1, C_res, tile)
    skip_ref  : (1, C_skip, tile)  tile-aligned slab covering the skip window
    xbuf_ref  : (C_res, tile + LA) VMEM splice buffer (x dtype)
    """
    tile = x_cur_ref.shape[-1]
    x_cur = x_cur_ref[0]                              # (C, tile), f32

    # Splice the current tile and the look-ahead head so both conv taps are
    # plain windowed reads of one contiguous buffer (no HBM copy of x).
    xbuf_ref[:, :tile] = x_cur                        # aligned store
    xbuf_ref[:, tile:] = x_la_ref[0]                  # aligned store (LA lanes)
    tap1 = xbuf_ref[:, dilation:dilation + tile]      # x[:, t + d], f32

    # Dilated conv (kernel_size=2): two MXU calls, f32 accumulation.
    dil = (jnp.dot(wd0_ref[...], x_cur.astype(mm_dtype),
                   preferred_element_type=jnp.float32)
           + jnp.dot(wd1_ref[...], tap1.astype(mm_dtype),
                     preferred_element_type=jnp.float32))   # (C, tile) f32

    # Gated activation: tanh(d)*sigmoid(d) == (1 - u)/(1 + u^2), u = exp(-d).
    # NOTE: padded / out-of-bounds lanes of the last tile flow through exp();
    # that is safe because every op here is column-independent and OOB output
    # columns are masked -- do not add cross-time reductions over `dil`.
    u = jnp.exp(-dil)
    gated = (1.0 - u) * pl.reciprocal(1.0 + u * u, approx=approx_recip)
    g = gated.astype(mm_dtype)

    # 1x1 conv_res + residual connection (residual tap stays f32).
    res = jnp.dot(wr_ref[...], g, preferred_element_type=jnp.float32) + br_ref[...]
    out_ref[0] = (res + tap1.astype(jnp.float32)).astype(out_ref.dtype)

    # 1x1 conv_skip only for tiles overlapping the last `skip_size` steps.
    @pl.when(pl.program_id(1) >= j0)
    def _():
        sk = jnp.dot(ws_ref[...], g, preferred_element_type=jnp.float32) + bs_ref[...]
        skip_ref[0] = sk.astype(skip_ref.dtype)


def residual_block(x_ncl, params, dilation, skip_size, *, tile_t=None,
                   use_bf16_matmul=True, out_dtype=None):
    """x_ncl: (B, C_res, T) (PyTorch NCL). Returns (out, skip) in NCL."""
    B, c_res, T = x_ncl.shape
    assert dilation >= 1
    t_out = T - dilation
    assert t_out >= 1
    assert 1 <= skip_size <= t_out, "skip_size must not exceed the conv output length"
    c_skip = params["w_skip"].shape[0]
    out_dtype = x_ncl.dtype if out_dtype is None else out_dtype
    mm_dtype = jnp.bfloat16 if use_bf16_matmul else x_ncl.dtype

    # Look-ahead width: enough 128-lane chunks to cover one dilation offset.
    la = 128 * pl.cdiv(dilation, 128)

    # ---- generation-aware VMEM budget & time-tile size ----------------------
    vmem_limit = (_vmem_capacity_bytes() * 3) // 4      # ~96 MiB v5e/v6e, ~48 MiB v7x
    out_isz = jnp.dtype(out_dtype).itemsize
    x_isz = jnp.dtype(x_ncl.dtype).itemsize
    per_lane = (3 * c_res * x_isz                        # x tile (x2 pipeline) + splice buffer
                + 2 * c_res * out_isz + 2 * c_skip * out_isz   # out/skip pipeline buffers
                + 8 * c_res * 4 + 2 * c_skip * 4)        # f32/bf16 temporaries (heuristic)
    if tile_t is None:
        tile = (vmem_limit // 2) // max(per_lane, 1)     # headroom: weights, look-ahead, spills
        tile = min(tile, 32768)                          # per-step DMA already large; cap work
    else:
        tile = tile_t
    tile = max(la, (tile // la) * la)                    # multiple of LA (hence of 128 lanes)
    tile = min(tile, max(la, pl.cdiv(t_out, la) * la))   # no wider than padded t_out
    nt = pl.cdiv(t_out, tile)
    n_la = pl.cdiv(T, la)                                # look-ahead blocks covering x
    blocks_per_tile = tile // la

    # First tile that overlaps the skip window [t_out - skip_size, t_out).
    j0 = (t_out - skip_size) // tile
    ns = nt - j0
    skip_off = (t_out - skip_size) - j0 * tile

    # ---- weights (tiny): matmul operands in mm_dtype, biases in f32 ---------
    wd0 = params["w_dil"][:, :, 0].astype(mm_dtype)
    wd1 = params["w_dil"][:, :, 1].astype(mm_dtype)
    wr = params["w_res"][:, :, 0].astype(mm_dtype)
    ws = params["w_skip"][:, :, 0].astype(mm_dtype)
    br = params["b_res"].astype(jnp.float32).reshape(c_res, 1)
    bs = params["b_skip"].astype(jnp.float32).reshape(c_skip, 1)

    kernel = partial(_residual_block_kernel, dilation=dilation, j0=j0,
                     mm_dtype=mm_dtype, approx_recip=use_bf16_matmul)

    out, skip_aligned = pl.pallas_call(
        kernel,
        out_shape=(jax.ShapeDtypeStruct((B, c_res, t_out), out_dtype),
                   jax.ShapeDtypeStruct((B, c_skip, ns * tile), out_dtype)),
        grid=(B, nt),
        in_specs=[
            # Current time tile of x (x read ~1x from HBM in total).
            pl.BlockSpec((1, c_res, tile), lambda b, j: (b, 0, j)),
            # Look-ahead head of the next tile (tiny).  Clamped in-bounds at the
            # end of the sequence; when clamped it only feeds masked output cols.
            pl.BlockSpec((1, c_res, la),
                         lambda b, j: (b, 0, jnp.minimum((j + 1) * blocks_per_tile,
                                                         n_la - 1))),
            pl.BlockSpec((c_res, c_res), lambda b, j: (0, 0)),    # W_dil tap 0
            pl.BlockSpec((c_res, c_res), lambda b, j: (0, 0)),    # W_dil tap 1
            pl.BlockSpec((c_res, c_res), lambda b, j: (0, 0)),    # W_res
            pl.BlockSpec((c_res, 1), lambda b, j: (0, 0)),        # b_res
            pl.BlockSpec((c_skip, c_res), lambda b, j: (0, 0)),   # W_skip
            pl.BlockSpec((c_skip, 1), lambda b, j: (0, 0)),       # b_skip
        ],
        out_specs=(
            pl.BlockSpec((1, c_res, tile), lambda b, j: (b, 0, j)),
            # Skip slab only spans tiles j0..nt-1; earlier steps map to block 0
            # without writing it (it is fully overwritten at step j0 before any
            # block-index change forces a writeback).
            pl.BlockSpec((1, c_skip, tile),
                         lambda b, j: (b, 0, jnp.maximum(j - j0, 0))),
        ),
        scratch_shapes=[pltpu.VMEM((c_res, tile + la), x_ncl.dtype)],
        compiler_params=pltpu.CompilerParams(
            dimension_semantics=("parallel", "arbitrary"),
            vmem_limit_bytes=int(vmem_limit)),
    )(x_ncl, x_ncl, wd0, wd1, wr, br, ws, bs)

    # Keep only the real skip window (garbage head/tail of the aligned slab is
    # sliced off; it is never returned).
    skip = skip_aligned[:, :, skip_off:skip_off + skip_size]
    return out, skip


def residual_block_ref(x, params, dilation, skip_size):
    """Pure-JAX reference mirroring the PyTorch forward (NCL layout)."""
    T = x.shape[2]
    w_dil = params["w_dil"]
    dil = (jnp.einsum("oi,bit->bot", w_dil[:, :, 0], x[:, :, :T - dilation])
           + jnp.einsum("oi,bit->bot", w_dil[:, :, 1], x[:, :, dilation:]))
    gated = jnp.tanh(dil) * jax.nn.sigmoid(dil)
    out = (jnp.einsum("oi,bit->bot", params["w_res"][:, :, 0], gated)
           + params["b_res"][None, :, None])
    out = out + x[:, :, -out.shape[2]:]
    skip = (jnp.einsum("oi,bit->bot", params["w_skip"][:, :, 0], gated)
            + params["b_skip"][None, :, None])
    skip = skip[:, :, -skip_size:]
    return out, skip


def init_params(key, res_channels, skip_channels):
    k = jax.random.split(key, 5)
    # CausalConv1d: Conv1d(res, res, kernel_size=2, dilation=d, padding=0, bias=False)
    w_dil = jax.random.normal(k[0], (res_channels, res_channels, 2), jnp.float32) * 0.3
    # conv_res / conv_skip: 1x1 Conv1d with default bias=True
    w_res = jax.random.normal(k[1], (res_channels, res_channels, 1), jnp.float32) * 0.3
    b_res = jax.random.normal(k[2], (res_channels,), jnp.float32) * 0.1
    w_skip = jax.random.normal(k[3], (skip_channels, res_channels, 1), jnp.float32) * 0.3
    b_skip = jax.random.normal(k[4], (skip_channels,), jnp.float32) * 0.1
    return {"w_dil": w_dil, "w_res": w_res, "b_res": b_res,
            "w_skip": w_skip, "b_skip": b_skip}


if __name__ == "__main__":
    B, C_RES, C_SKIP = 2, 4, 8
    T, DILATION, SKIP_SIZE = 300, 4, 100

    key = jax.random.PRNGKey(0)
    kx, kp = jax.random.split(key)
    x = jax.random.normal(kx, (B, C_RES, T), jnp.float32)   # NCL, like PyTorch
    params = init_params(kp, C_RES, C_SKIP)

    out_r, skip_r = residual_block_ref(x, params, DILATION, SKIP_SIZE)

    # f32 path, forced multi-tile (tile=128 -> 3 time tiles; skip window starts
    # inside tile 1, so the pl.when skip guard and the clamped look-ahead block
    # are both exercised).
    out, skip = residual_block(x, params, DILATION, SKIP_SIZE,
                               tile_t=128, use_bf16_matmul=False)
    out, skip = jax.block_until_ready(out), jax.block_until_ready(skip)
    assert out.shape == (B, C_RES, T - DILATION)
    assert skip.shape == (B, C_SKIP, SKIP_SIZE)
    assert jnp.allclose(out, out_r, atol=1e-4, rtol=1e-4)
    assert jnp.allclose(skip, skip_r, atol=1e-4, rtol=1e-4)

    # Default path: auto tile size (single tile here) + bf16 MXU operands
    # (residual stays f32); looser tolerance accounts for bf16 rounding.
    out2, skip2 = residual_block(x, params, DILATION, SKIP_SIZE)
    out2, skip2 = jax.block_until_ready(out2), jax.block_until_ready(skip2)
    assert out2.shape == (B, C_RES, T - DILATION)
    assert skip2.shape == (B, C_SKIP, SKIP_SIZE)
    assert jnp.allclose(out2, out_r, atol=1e-1, rtol=1e-1)
    assert jnp.allclose(skip2, skip_r, atol=1e-1, rtol=1e-1)

    print("KERNEL_OK")
</pallas_src>

<mosaic_0001>
module attributes {stable_mosaic.version = 11 : i64} {
  func.func @_residual_block_kernel(%arg0: i32, %arg1: i32, %arg2: memref<1x4x128xf32, #tpu.memory_space<vmem>>, %arg3: memref<1x4x128xf32, #tpu.memory_space<vmem>>, %arg4: memref<4x4xf32, #tpu.memory_space<vmem>>, %arg5: memref<4x4xf32, #tpu.memory_space<vmem>>, %arg6: memref<4x4xf32, #tpu.memory_space<vmem>>, %arg7: memref<4x1xf32, #tpu.memory_space<vmem>>, %arg8: memref<8x4xf32, #tpu.memory_space<vmem>>, %arg9: memref<8x1xf32, #tpu.memory_space<vmem>>, %arg10: memref<1x4x128xf32, #tpu.memory_space<vmem>>, %arg11: memref<1x8x128xf32, #tpu.memory_space<vmem>>, %arg12: memref<4x256xf32, #tpu.memory_space<vmem>>) attributes {dimension_semantics = [#tpu.dimension_semantics<parallel>, #tpu.dimension_semantics<arbitrary>], iteration_bounds = array<i64: 2, 3>, scalar_prefetch = 0 : i64, scratch_operands = 1 : i64, tpu.core_type = #tpu.core_type<tc>, window_params = [{transform_indices = @transform_0, window_bounds = array<i64: 1, 4, 128>}, {transform_indices = @transform_1, window_bounds = array<i64: 1, 4, 128>}, {pipeline_mode = #tpu.pipeline_mode<synchronous>, transform_indices = @transform_2, window_bounds = array<i64: 4, 4>}, {pipeline_mode = #tpu.pipeline_mode<synchronous>, transform_indices = @transform_3, window_bounds = array<i64: 4, 4>}, {pipeline_mode = #tpu.pipeline_mode<synchronous>, transform_indices = @transform_4, window_bounds = array<i64: 4, 4>}, {pipeline_mode = #tpu.pipeline_mode<synchronous>, transform_indices = @transform_5, window_bounds = array<i64: 4, 1>}, {pipeline_mode = #tpu.pipeline_mode<synchronous>, transform_indices = @transform_6, window_bounds = array<i64: 8, 4>}, {pipeline_mode = #tpu.pipeline_mode<synchronous>, transform_indices = @transform_7, window_bounds = array<i64: 8, 1>}, {transform_indices = @transform_8, window_bounds = array<i64: 1, 4, 128>}, {transform_indices = @transform_9, window_bounds = array<i64: 1, 8, 128>}]} {
    %c0 = arith.constant 0 : index
    %c0_0 = arith.constant 0 : index
    %c0_1 = arith.constant 0 : index
    %0 = vector.load %arg2[%c0, %c0_0, %c0_1] : memref<1x4x128xf32, #tpu.memory_space<vmem>>, vector<1x4x128xf32>
    %1 = vector.shape_cast %0 : vector<1x4x128xf32> to vector<4x128xf32>
    %c0_2 = arith.constant 0 : index
    %c0_3 = arith.constant 0 : index
    %2 = vector.load %arg12[%c0_2, %c0_3] : memref<4x256xf32, #tpu.memory_space<vmem>>, vector<4x128xf32>
    tpu.vector_store %arg12[%c0_2, %c0_3], %1 {strides = array<i32>} : memref<4x256xf32, #tpu.memory_space<vmem>>, vector<4x128xf32>,
    %c0_4 = arith.constant 0 : index
    %c0_5 = arith.constant 0 : index
    %c0_6 = arith.constant 0 : index
    %3 = vector.load %arg3[%c0_4, %c0_5, %c0_6] : memref<1x4x128xf32, #tpu.memory_space<vmem>>, vector<1x4x128xf32>
    %4 = vector.shape_cast %3 : vector<1x4x128xf32> to vector<4x128xf32>
    %c0_7 = arith.constant 0 : index
    %c128 = arith.constant 128 : index
    %5 = vector.load %arg12[%c0_7, %c128] : memref<4x256xf32, #tpu.memory_space<vmem>>, vector<4x128xf32>
    tpu.vector_store %arg12[%c0_7, %c128], %4 {strides = array<i32>} : memref<4x256xf32, #tpu.memory_space<vmem>>, vector<4x128xf32>,
    %c0_8 = arith.constant 0 : index
    %c4 = arith.constant 4 : index
    %6 = vector.load %arg12[%c0_8, %c4] : memref<4x256xf32, #tpu.memory_space<vmem>>, vector<4x128xf32>
    %c0_9 = arith.constant 0 : index
    %c0_10 = arith.constant 0 : index
    %7 = vector.load %arg4[%c0_9, %c0_10] : memref<4x4xf32, #tpu.memory_space<vmem>>, vector<4x4xf32>
    %cst = arith.constant dense<0.000000e+00> : vector<4x128xf32>
    %8 = tpu.matmul %7, %1, %cst {dimension_numbers = #tpu.dot_dimension_numbers<[1], [0], [0], [1], [0, 0, 1, 1], [], []>} : vector<4x4xf32>, vector<4x128xf32>, vector<4x128xf32> -> vector<4x128xf32>
    %c0_11 = arith.constant 0 : index
    %c0_12 = arith.constant 0 : index
    %9 = vector.load %arg5[%c0_11, %c0_12] : memref<4x4xf32, #tpu.memory_space<vmem>>, vector<4x4xf32>
    %cst_13 = arith.constant dense<0.000000e+00> : vector<4x128xf32>
    %10 = tpu.matmul %9, %6, %cst_13 {dimension_numbers = #tpu.dot_dimension_numbers<[1], [0], [0], [1], [0, 0, 1, 1], [], []>} : vector<4x4xf32>, vector<4x128xf32>, vector<4x128xf32> -> vector<4x128xf32>
    %11 = arith.addf %8, %10 : vector<4x128xf32>
    %cst_14 = arith.constant 0.000000e+00 : f32
    %12 = vector.broadcast %cst_14 : f32 to vector<4x128xf32>
    %13 = arith.subf %12, %11 : vector<4x128xf32>
    %14 = math.exp %13 : vector<4x128xf32>
    %cst_15 = arith.constant 1.000000e+00 : f32
    %15 = vector.broadcast %cst_15 : f32 to vector<4x128xf32>
    %16 = arith.subf %15, %14 : vector<4x128xf32>
    %17 = arith.mulf %14, %14 : vector<4x128xf32>
    %cst_16 = arith.constant 1.000000e+00 : f32
    %18 = vector.broadcast %cst_16 : f32 to vector<4x128xf32>
    %19 = arith.addf %18, %17 : vector<4x128xf32>
    %20 = tpu.reciprocal %19 : vector<4x128xf32> -> vector<4x128xf32>
    %21 = arith.mulf %16, %20 : vector<4x128xf32>
    %c0_17 = arith.constant 0 : index
    %c0_18 = arith.constant 0 : index
    %22 = vector.load %arg6[%c0_17, %c0_18] : memref<4x4xf32, #tpu.memory_space<vmem>>, vector<4x4xf32>
    %cst_19 = arith.constant dense<0.000000e+00> : vector<4x128xf32>
    %23 = tpu.matmul %22, %21, %cst_19 {dimension_numbers = #tpu.dot_dimension_numbers<[1], [0], [0], [1], [0, 0, 1, 1], [], []>} : vector<4x4xf32>, vector<4x128xf32>, vector<4x128xf32> -> vector<4x128xf32>
    %c0_20 = arith.constant 0 : index
    %c0_21 = arith.constant 0 : index
    %24 = vector.load %arg7[%c0_20, %c0_21] : memref<4x1xf32, #tpu.memory_space<vmem>>, vector<4x1xf32>
    %25 = vector.broadcast %24 : vector<4x1xf32> to vector<4x128xf32>
    %26 = arith.addf %23, %25 : vector<4x128xf32>
    %27 = arith.addf %26, %6 : vector<4x128xf32>
    %c0_22 = arith.constant 0 : index
    %c0_23 = arith.constant 0 : index
    %c0_24 = arith.constant 0 : index
    %28 = vector.load %arg10[%c0_22, %c0_23, %c0_24] : memref<1x4x128xf32, #tpu.memory_space<vmem>>, vector<1x4x128xf32>
    %29 = vector.shape_cast %28 : vector<1x4x128xf32> to vector<4x128xf32>
    %30 = vector.shape_cast %27 : vector<4x128xf32> to vector<1x4x128xf32>
    tpu.vector_store %arg10[%c0_22, %c0_23, %c0_24], %30 {strides = array<i32>} : memref<1x4x128xf32, #tpu.memory_space<vmem>>, vector<1x4x128xf32>,
    %c1_i32 = arith.constant 1 : i32
    %31 = arith.cmpi sge, %arg1, %c1_i32 : i32
    %32 = arith.extui %31 : i1 to i32
    %c0_i32 = arith.constant 0 : i32
    %33 = arith.cmpi ne, %32, %c0_i32 : i32
    scf.if %33 {
      %c0_25 = arith.constant 0 : index
      %c0_26 = arith.constant 0 : index
      %34 = vector.load %arg8[%c0_25, %c0_26] : memref<8x4xf32, #tpu.memory_space<vmem>>, vector<8x4xf32>
      %cst_27 = arith.constant dense<0.000000e+00> : vector<8x128xf32>
      %35 = tpu.matmul %34, %21, %cst_27 {dimension_numbers = #tpu.dot_dimension_numbers<[1], [0], [0], [1], [0, 0, 1, 1], [], []>} : vector<8x4xf32>, vector<4x128xf32>, vector<8x128xf32> -> vector<8x128xf32>
      %c0_28 = arith.constant 0 : index
      %c0_29 = arith.constant 0 : index
      %36 = vector.load %arg9[%c0_28, %c0_29] : memref<8x1xf32, #tpu.memory_space<vmem>>, vector<8x1xf32>
      %37 = vector.broadcast %36 : vector<8x1xf32> to vector<8x128xf32>
      %38 = arith.addf %35, %37 : vector<8x128xf32>
      %c0_30 = arith.constant 0 : index
      %c0_31 = arith.constant 0 : index
      %c0_32 = arith.constant 0 : index
      %39 = vector.load %arg11[%c0_30, %c0_31, %c0_32] : memref<1x8x128xf32, #tpu.memory_space<vmem>>, vector<1x8x128xf32>
      %40 = vector.shape_cast %39 : vector<1x8x128xf32> to vector<8x128xf32>
      %41 = vector.shape_cast %38 : vector<8x128xf32> to vector<1x8x128xf32>
      tpu.vector_store %arg11[%c0_30, %c0_31, %c0_32], %41 {strides = array<i32>} : memref<1x8x128xf32, #tpu.memory_space<vmem>>, vector<1x8x128xf32>,
    } else {
    }
    return
  }
  func.func @transform_0(%arg0: i32, %arg1: i32) -> (i32, i32, i32) {
    %c0_i32 = arith.constant 0 : i32
    %c0_i32_0 = arith.constant 0 : i32
    return %arg0, %c0_i32, %arg1 : i32, i32, i32
  }
  func.func @transform_1(%arg0: i32, %arg1: i32) -> (i32, i32, i32) {
    %c1_i32 = arith.constant 1 : i32
    %0 = arith.addi %arg1, %c1_i32 : i32
    %c1_i32_0 = arith.constant 1 : i32
    %1 = arith.muli %0, %c1_i32_0 : i32
    %c2_i32 = arith.constant 2 : i32
    %2 = arith.minsi %1, %c2_i32 : i32
    %c0_i32 = arith.constant 0 : i32
    %c0_i32_1 = arith.constant 0 : i32
    return %arg0, %c0_i32, %2 : i32, i32, i32
  }
  func.func @transform_2(%arg0: i32, %arg1: i32) -> (i32, i32) {
    %c0_i32 = arith.constant 0 : i32
    %c0_i32_0 = arith.constant 0 : i32
    %c0_i32_1 = arith.constant 0 : i32
    return %c0_i32, %c0_i32_0 : i32, i32
  }
  func.func @transform_3(%arg0: i32, %arg1: i32) -> (i32, i32) {
    %c0_i32 = arith.constant 0 : i32
    %c0_i32_0 = arith.constant 0 : i32
    %c0_i32_1 = arith.constant 0 : i32
    return %c0_i32, %c0_i32_0 : i32, i32
  }
  func.func @transform_4(%arg0: i32, %arg1: i32) -> (i32, i32) {
    %c0_i32 = arith.constant 0 : i32
    %c0_i32_0 = arith.constant 0 : i32
    %c0_i32_1 = arith.constant 0 : i32
    return %c0_i32, %c0_i32_0 : i32, i32
  }
  func.func @transform_5(%arg0: i32, %arg1: i32) -> (i32, i32) {
    %c0_i32 = arith.constant 0 : i32
    %c0_i32_0 = arith.constant 0 : i32
    %c0_i32_1 = arith.constant 0 : i32
    return %c0_i32, %c0_i32_0 : i32, i32
  }
  func.func @transform_6(%arg0: i32, %arg1: i32) -> (i32, i32) {
    %c0_i32 = arith.constant 0 : i32
    %c0_i32_0 = arith.constant 0 : i32
    %c0_i32_1 = arith.constant 0 : i32
    return %c0_i32, %c0_i32_0 : i32, i32
  }
  func.func @transform_7(%arg0: i32, %arg1: i32) -> (i32, i32) {
    %c0_i32 = arith.constant 0 : i32
    %c0_i32_0 = arith.constant 0 : i32
    %c0_i32_1 = arith.constant 0 : i32
    return %c0_i32, %c0_i32_0 : i32, i32
  }
  func.func @transform_8(%arg0: i32, %arg1: i32) -> (i32, i32, i32) {
    %c0_i32 = arith.constant 0 : i32
    %c0_i32_0 = arith.constant 0 : i32
    return %arg0, %c0_i32, %arg1 : i32, i32, i32
  }
  func.func @transform_9(%arg0: i32, %arg1: i32) -> (i32, i32, i32) {
    %c1_i32 = arith.constant 1 : i32
    %0 = arith.subi %arg1, %c1_i32 : i32
    %c0_i32 = arith.constant 0 : i32
    %1 = arith.maxsi %0, %c0_i32 : i32
    %c0_i32_0 = arith.constant 0 : i32
    %c0_i32_1 = arith.constant 0 : i32
    return %arg0, %c0_i32_0, %1 : i32, i32, i32
  }
}

</mosaic_0001>

<bundles_post_ra>
// kernel: tpu_custom_call.1
= control target key start
LH: loop header
LB: loop body
LE: loop exit
PB: predicated region body
PF: predicated region fallthrough
CT: control target
= control target key end

     0   :  { %s1836_s0 = inlined_call_operand.vmem [shape: f32[2,4,300], index: 0, kind: input, shape index: {}]   ;;  %s1837_s1 = inlined_call_operand.hbm [shape: f32[2,4,300], index: 1, kind: input, shape index: {}]   ;;  %s1838_s2 = inlined_call_operand.vmem [shape: f32[4,4], index: 2, kind: input, shape index: {}]   ;;  %s1839_s3 = inlined_call_operand.hbm [shape: f32[4,4], index: 3, kind: input, shape index: {}]   ;;  %s1840_s4 = inlined_call_operand.vmem [shape: f32[4,4], index: 4, kind: input, shape index: {}]   ;;  %s1841_s5 = inlined_call_operand.vmem [shape: f32[4,1], index: 5, kind: input, shape index: {}]   ;;  %s1842_s6 = inlined_call_operand.vmem [shape: f32[8,4], index: 6, kind: input, shape index: {}]   ;;  %s1843_s7 = inlined_call_operand.vmem [shape: f32[8,1], index: 7, kind: input, shape index: {}]   ;;  %s1844_s8 = inlined_call_operand.hbm [shape: f32[2,4,296], index: 8, kind: output, shape index: {0}]   ;;  %s1845_s9 = inlined_call_operand.hbm [shape: f32[2,8,256], index: 9, kind: output, shape index: {1}]  }
   0x1   :  { %1865 = sst [smem:[#allocation29_spill]] %s1838_s2 }
   0x2   :  { %1866 = sst [smem:[#allocation30_spill]] %s1839_s3 }
   0x3   :  { %1867 = sst [smem:[#allocation31_spill]] %s1840_s4 }
   0x4   :  { %1868 = sst [smem:[#allocation32_spill]] %s1841_s5 }
   0x5   :  { %1869 = sst [smem:[#allocation33_spill]] %s1842_s6 }
   0x6   :  { %1870 = sst [smem:[#allocation34_spill]] %s1843_s7 }
   0x7   :  { %1871 = sst [smem:[#allocation35_spill]] %s1844_s8 }
   0x8   :  { %1872 = sst [smem:[#allocation36_spill]] %s1845_s9 }
   0x9   :  { %15 = vsyncpa [#allocation4], 0 }
   0xa   :  { %17 = vsyncpa [#allocation4 + $0x1], 0 }
   0xb   :  { %18 = vsyncpa [#allocation7], 0 }
   0xc   :  { %19 = vsyncpa [#allocation5], 0 }
   0xd   :  { %21 = vsyncpa [#allocation5 + $0x1], 0 }
   0xe   :  { %22 = vsyncpa [#allocation10], 0 }
   0xf   :  { %24 = vsyncpa [#allocation10 + $0x1], 0  ;;  %s1492_s30 = smov 0   ;;  %s1494_s10 = smov 0  }
  0x10   :  { %s1496_s11 = smov 0   ;;  %s1498_s12 = smov 0  }
  0x11   :  { %s1500_s13 = smov 0   ;;  %s1502_s14 = smov 0  }
  0x12   :  { %s1504_s15 = smov 0   ;;  %s1506_s16 = smov 0  }
  0x13   :  { %s1508_s17 = smov 0   ;;  %s1510_s18 = smov 0  }
  0x14   :  { %s1512_s19 = smov 0   ;;  %s1514_s20 = smov 0  }
  0x15   :  { %s1516_s21 = smov 0   ;;  %s1518_s22 = smov 0  }
  0x16 LB: > { %1873 = sst [smem:[#allocation15_spill]] %s1377_s30  ;;  %s977_s23 = sadd.s32 4294967295, %s1429_s22   ;;  %s1429_s22 = sphi %s1518_s22, %s30_s22   ;;  %s1425_s21 = sphi %s1516_s21, %s1935_s21   ;;  %s1421_s20 = sphi %s1514_s20, %s1934_s20   ;;  %s1417_s19 = sphi %s1512_s19, %s1933_s19   ;;  %s1413_s18 = sphi %s1510_s18, %s1925_s18   ;;  %s1409_s17 = sphi %s1508_s17, %s1924_s17   ;;  %s1405_s16 = sphi %s1506_s16, %s1932_s16   ;;  %s1401_s15 = sphi %s1504_s15, %s1931_s15   ;;  %s1397_s14 = sphi %s1502_s14, %s1922_s14   ;;  %s1393_s13 = sphi %s1500_s13, %s1921_s13   ;;  %s1389_s12 = sphi %s1498_s12, %s1920_s12   ;;  %s1385_s11 = sphi %s1496_s11, %s1930_s11   ;;  %s1381_s10 = sphi %s1494_s10, %s1929_s10   ;;  %s1377_s30 = sphi %s1492_s30, %s1928_s30  }
  0x17   : > { %1874 = sst [smem:[#allocation16_spill]] %s1389_s12  ;;  %s978_s24 = sadd.s32 4294967294, %s1429_s22  }
  0x18   : > { %1875 = sst [smem:[#allocation17_spill]] %s1393_s13  ;;  %p98_p0 = scmp.ne.s32.totalorder %s1405_s16, %s1401_s15 }
  0x19   : > { %1876 = sst [smem:[#allocation18_spill]] %s1397_s14  ;;  %p1563_p1 = scmp.eq.s32.totalorder %s977_s23, 0 }
  0x1a   : > { %1877 = sst [smem:[#allocation19_spill]] %s1409_s17  ;;  %p249_p2 = scmp.ne.s32.totalorder %s1397_s14, %s1393_s13 }
  0x1b   : > { %1878 = sst [smem:[#allocation20_spill]] %s1421_s20  ;;  %p1572_p3 = por %p1563_p1, %p98_p0 }
  0x1c   : > { %p250_p4 = scmp.eq.s32.totalorder %s977_s23, 5  ;;  %p255_p5 = scmp.ne.s32.totalorder %s1393_s13, %s1389_s12 }
  0x1d   : > { %p256_p6 = scmp.eq.s32.totalorder %s978_s24, 5  ;;  %p283_p9 = scmp.ne.s32.totalorder %s1385_s11, %s1381_s10 }
  0x1e   : > { %p1578_p7 = por %p250_p4, %p249_p2  ;;  %p289_p10 = scmp.ne.s32.totalorder %s1381_s10, %s1377_s30 }
  0x1f   : > { %p1583_p8 = por %p256_p6, %p255_p5  ;;  %p981_p11 = scmp.ge.s32.totalorder %s1429_s22, 1 }
  0x20   : > { %s1881_s28 = scalar_select %p1578_p7, 1, 0 }
  0x21   : > { %s1883_s15 = scalar_select %p1583_p8, 1, 0 }
  0x22   : > { %1882 = sst [smem:[#allocation21_spill]] %s1881_s28  ;;  %p1592_p12 = por %p283_p9, %p250_p4 }
  0x23   : > { %1884 = sst [smem:[#allocation22_spill]] %s1883_s15  ;;  %p297_p13 = scmp.lt.s32.totalorder %s1429_s22, 7 }
  0x24   : > { %s1885_s26 = scalar_select %p1592_p12, 1, 0 }
  0x25   : > { %p1597_p0 = por %p289_p10, %p256_p6  ;;  %p1601_p2 = pnand %p981_p11, %p297_p13 }
  0x26   : > { %1886 = sst [smem:[#allocation23_spill]] %s1885_s26  ;;  %s1431_s29 = smov [#allocation6]  }
  0x27   : > { %s1887_s23 = scalar_select %p1597_p0, 1, 0 }
  0x28   : > { %s313_s12 = sshll.u32 %s1431_s29, 4  ;;  %p1050_p5 = pneg %p1601_p2  ;;  %s314_s12 = int_to_ptr.vmem [resolvable:$true] %s313_s12 }
  0x29   : > { %1888 = sst [smem:[#allocation24_spill]] %s1887_s23  ;;  %s1208_s30 = scalar_lea.vmem %s314_s12, 64 }
  0x2a   : > { %p1051_p4 = pnand %p1050_p5, %p1563_p1  ;;  %p1209_p8 = scmp.ne.s32.totalorder %s314_s12, %s1208_s30 }
  0x2b   : > { %p1216_p10 = scmp.lt.s32.totalorder %s314_s12, %s314_s12  ;;  %p1217_p7 = scmp.lt.s32.totalorder %s1208_s30, %s1208_s30 }
  0x2c   : > { %p1199_p9 = pneg %p1051_p4 }
  0x2d   : > { %p1218_p0 = por %p1217_p7, %p1216_p10 }
  0x2e   : > { %p1211_p12 = pnand %p1209_p8, %p1199_p9 }
  0x30   : > { %p1212_p6 = pneg %p1211_p12 }
  0x32   : > { %p1219_p11 = pnand %p1218_p0, %p1212_p6 }
  0x34   : > { %1222 = shalt.err (!%p1219_p11)
}
  0x35   : > { %s1890_s3 = sld [smem:[#allocation30_spill]]  ;;  %s39_s29 = sadd.s32 1, %s1421_s20 }
  0x36   : > { %s42_s9 = sadd.s32 1, %s1425_s21  ;;  %p40_p8 = scmp.ge.s32.totalorder %s39_s29, 3 }
  0x37   : > { %p75_p12 = scmp.lt.s32.totalorder %s39_s29, 2  ;;  %s85_s30 = sadd.s32 1, %s1409_s17 }
  0x38   : > { %p92_p7 = scmp.ne.s32.totalorder %s1409_s17, %s1405_s16  ;;  %s1937_s9 = smov (!%p40_p8, %s42_s9), %s1425_s21 }
  0x39   : > { %s1617_s26 = scalar_select %p40_p8, 0, %s39_s29  }
  0x3a   : > { %s1939_s29 = smov (!%p75_p12, %s39_s29), 2  ;;  %p44_p13 = scmp.ge.s32.totalorder %s1937_s9, 2 }
  0x3b   : > { %1053 = dma.hbm_to_vmem [thread:$0]  (!%p1051_p4), %s1890_s3, 64, %s314_s12, [#allocation7]  }
  0x3c   : > { %1891 = sst [smem:[#allocation25_spill]] %s1617_s26  ;;  %s77_s12 = sadd.s32 1, %s1617_s26 }
  0x3d   : > { %p78_p0 = scmp.lt.s32.totalorder %s77_s12, 2  ;;  %p93_p5 = scmp.eq.s32.totalorder %s1429_s22, 0 }
  0x3e   : > { %s1941_s9 = smov (%p44_p13, %s1937_s9), 0  ;;  %s235_s8 = ssub.s32 %s1421_s20, %s1617_s26 }
  0x3f   : > { %1892 = sst [smem:[#allocation26_spill]] %s1941_s9  ;;  %s1943_s12 = smov (!%p78_p0, %s77_s12), 2 }
  0x40   : > { %s80_s15 = ssub.s32 %s1425_s21, %s1941_s9  ;;  %p1628_p4 = por %p93_p5, %p92_p7 }
  0x41   : > { %s81_s3 = ssub.s32 %s1939_s29, %s1943_s12  ;;  %s236_s7 = sor.u32 %s235_s8, %s80_s15 }
  0x42   : > { %s82_s28 = sor.u32 %s81_s3, %s80_s15  ;;  %p237_p6 = scmp.eq.s32.totalorder %s236_s7, 0 }
  0x43   : > { %p83_p9 = scmp.eq.s32.totalorder %s82_s28, 0  ;;  %s979_s6 = sadd.s32 4294967295, %s1421_s20 }
  0x44   : > { %s980_s4 = sadd.s32 4294967295, %s1617_s26  ;;  %s1895_s5 = sadd.s32 1, %s1397_s14 }
  0x45   : > { %s1638_s13 = scalar_select %p83_p9, %s1409_s17, %s85_s30  }
  0x46   : > { %s1643_s2 = scalar_select %p237_p6, %s1397_s14, %s1895_s5  }
  0x47   : > { %1894 = sst [smem:[#allocation27_spill]] %s1638_s13  ;;  %p263_p10 = scmp.gt.s32.totalorder %s979_s6, 0 }
  0x48   : > { %1896 = sst [smem:[#allocation28_spill]] %s1643_s2  ;;  %p266_p11 = scmp.gt.s32.totalorder %s980_s4, 0 }
  0x49   : > { %p1066_p8 = scmp.lt.s32.totalorder %s1429_s22, 6  ;;  %s347_s3 = sand.u32 1, %s1409_s17  }
  0x4a   : > { %s1945_s6 = smov (!%p263_p10, %s979_s6), 0  ;;  %s1947_s4 = smov (!%p266_p11, %s980_s4), 0 }
  0x4b   : > { %s984_s8 = sshll.u32 %s347_s3, 2  ;;  %s269_s7 = ssub.s32 %s1945_s6, %s1947_s4 }
  0x4c   : > { %s270_s28 = sor.u32 %s269_s7, %s80_s15  ;;  %s1037_s12 = smul.u32 3, %s1425_s21 }
  0x4d   : > { %p271_p12 = scmp.eq.s32.totalorder %s270_s28, 0  ;;  %s351_s30 = scalar_lea.vmem [#allocation3], %s984_s8 }
  0x4e   : > { %s363_s9 = sshll.u32 %s351_s30, 4  ;;  %s359_s26 = sadd.s32 %s1037_s12, %s1939_s29  ;;  %s364_s9 = int_to_ptr.vmem [resolvable:$true] %s363_s9 }
  0x4f   : > { %s1897_s5 = sadd.s32 1, %s1385_s11  ;;  %s985_s13 = sshll.u32 %s359_s26, 6 }
  0x50   : > { %s1652_s20 = scalar_select %p271_p12, %s1385_s11, %s1897_s5  }
  0x51   : > { %p1658_p7 = pnand %p1066_p8, %p1628_p4  ;;  %s361_s4 = scalar_lea.hbm %s1837_s1, %s985_s13 }
  0x52   : > { %s348_s6 = scalar_lea.sflag [#allocation4], %s347_s3  ;;  %s1236_s29 = scalar_lea.vmem %s364_s9, 64 }
  0x53   : > { %p1225_p13 = pneg %p1658_p7  ;;  %p1237_p0 = scmp.ne.s32.totalorder %s364_s9, %s1236_s29 }
  0x54   : > { %s1432_s15 = smov [#allocation3]  }
  0x55   : > { %p1239_p5 = pnand %p1237_p0, %p1225_p13  ;;  %s1241_s26 = sshll.u32 %s1432_s15, 4  ;;  %s1242_s26 = int_to_ptr.vmem [resolvable:$false] %s1241_s26 }
  0x56   : > { %s1243_s23 = scalar_lea.vmem %s1242_s26, 128  ;;  %p1244_p4 = scmp.lt.s32.totalorder %s364_s9, %s1242_s26 }
  0x57   : > { %p1240_p9 = pneg %p1239_p5  ;;  %p1245_p6 = scmp.lt.s32.totalorder %s1243_s23, %s1236_s29 }
  0x59   : > { %p1246_p10 = por %p1245_p6, %p1244_p4 }
  0x5b   : > { %p1247_p11 = pnand %p1246_p10, %p1240_p9 }
  0x5d   : > { %1250 = shalt.err (!%p1247_p11)
}
  0x5e   : > { %1057 = dma.hbm_to_vmem [thread:$0]  (!%p1658_p7), %s361_s4, 64, %s364_s9, %s348_s6  }
  0x5f   : > { %372 = sbr.rel (%p1601_p2) target bundleno = 927 (0x39f), region = 52  ;;  %s374_s13 = sand.u32 (!%p1601_p2), 1, %s1405_s16  }
  0x60   : > { %s987_s14 = sshll.u32 (!%p1601_p2), %s374_s13, 2  ;;  %s375_s17 = scalar_lea.sflag (!%p1601_p2), [#allocation4], %s374_s13 }
  0x61   : > { %s378_s3 = scalar_lea.vmem (!%p1601_p2), [#allocation3], %s987_s14 }
  0x64   : > { %1360 = dma.done.wait (%p1572_p3), %s375_s17, 64  }
  0x65   : > { %1362 = vsyncadd (%p1572_p3), %s375_s17, 4294967232 }
  0x66   : > { %1364 = dma.done.wait (%p1563_p1), [#allocation7], 64  }
  0x67   : > { %1366 = vsyncadd (%p1563_p1), [#allocation7], 4294967232  ;;  %p430_p2 = scmp.lt.s32.totalorder %s1417_s19, 1  ;;  %p432_p8 = scmp.lt.s32.totalorder %s1413_s18, 2  ;;  %v1433_v0 = vmov 0.0   ;;  %vm1434_vm0 = vmmov 0  }
  0x68   : > { %1022 = vmatprep.subr.mxu1 %v1433_v0  ;;  %1024 = vmatprep.mubr.msk.f32.mxu1 %vm1434_vm0, %v1433_v0  ;;  %v446_v1 = vld [vmem:[%s378_s3] sm:$0xf]  ;;  %vm463_vm1 = vcmask 1043456   ;;  %s427_s12 = sand.u32 1, %s1381_s10   ;;  %s1899_s4 = sld [smem:[#allocation29_spill]]  ;;  %vm459_vm2 = vcmask 31744  }
  0x69   : > { %s431_s2 = scalar_select %p430_p2, %s1417_s19, 1  ;;  %1017 = vmatprep.subr.mxu0 %v1433_v0  ;;  %1019 = vmatprep.mubr.msk.f32.mxu0 %vm1434_vm0, %v1433_v0  ;;  %447 = vst [vmem:[#allocation2 + $0x4] sm:$0xf] %v446_v1  ;;  %vm457_vm3 = vcmask 1014784   ;;  %v450_v8 = vld [vmem:[#allocation6] sm:$0xf] }
  0x6a   : > { %s433_s9 = scalar_select %p432_p8, %s1413_s18, 2  ;;  %v1436_v13 = vmov 0  }
  0x6b   : > { %s1038_s24 = smul.u32 3, %s431_s2  ;;  %s1695_s6 = sshll.u32 %s427_s12, 3  ;;  %1189 = vset.pattern.permute.xlu1 %v1436_v13  ;;  %1190 = vset.pattern.permute.xlu0 %v1436_v13 }
  0x6c   : > { %s1435_s29 = smov 124   ;;  %s1900_s23 = sld [smem:[#allocation32_spill]] }
  0x6d   : > { %s435_s27 = sadd.s32 %s1038_s24, %s433_s9  ;;  %s1901_s13 = sld [smem:[#allocation17_spill]] }
  0x6e   : > { %s991_s25 = sshll.u32 %s435_s27, 2  ;;  %v449_v2 = vld [vmem:[%s1899_s4] sm:$0xf]  ;;  %s1902_s3 = sld [smem:[#allocation31_spill]] }
  0x6f   : > { %s437_s28 = scalar_lea.vmem %s1836_s0, %s991_s25  ;;  %s429_s27 = scalar_lea.vmem [#allocation9], %s1695_s6 }
  0x70   : > { %v444_v3 = vld [vmem:[%s437_s28] sm:$0xf]  ;;  %p998_p1 = scmp.lt.s32.totalorder %s1413_s18, 1 }
  0x71   : > { %445 = vst [vmem:[#allocation2] sm:$0xf] %v444_v3  ;;  %1023 = vmatpush3.msk.msra.mxu1 %vm463_vm1, %v444_v3  ;;  %s1903_s7 = sld [smem:[#allocation33_spill]] (!%p998_p1) }
  0x72   : > { %1025 = vmatmul.mubr.msk.f32.vlgmr.msra.gmra.mxu1 %vm459_vm2, %v449_v2  ;;  %v621_v12 = vld [vmem:[%s1900_s23] sm:$0xf]  ;;  %s1904_s5 = sld [smem:[#allocation34_spill]] (!%p998_p1) }
  0x73   : > { %624 = vperm.xlu1 %1189, %v621_v12   ;;  %s420_s2 = sand.u32 1, %s1901_s13  }
  0x74   : > { %v620_v25 = vld [vmem:[%s1902_s3] sm:$0xf]  ;;  %s989_s9 = sshll.u32 %s420_s2, 2 }
  0x75   : > { %s422_s24 = scalar_lea.vmem [#allocation8], %s989_s9 }
  0x78   : > { %v448_v4 = vld [vmem:[#allocation2] sm:$0xff] }
  0x79   : > { %453 = vrot.lane.b32.xlu0 %v448_v4, %s1435_s29  ;;  %v452_v5 = vcombine.high %v448_v4, %v448_v4 }
  0x7d   : > { %455 = vrot.lane.b32.xlu0 %v452_v5, %s1435_s29 }
  0xeb   : > { %v454_v6 = vpop.permute.xlu0 %453 }
  0xee   : > { %v625_v26 = vpop.permute.xlu1 %624 }
  0xef   : > { %v456_v7 = vpop.permute.xlu0 %455 }
  0xf0   : > { %v458_v9 = vsel %vm457_vm3, %v454_v6, %v456_v7 }
  0xf1   : > { %1018 = vmatpush3.msk.msra.mxu0 %vm463_vm1, %v458_v9 }
  0xf2   : > { %1020 = vmatmul.mubr.msk.f32.vlgmr.msra.gmra.mxu0 %vm459_vm2, %v450_v8  ;;  %1027 = vmatprep.subr.mxu0 %v1433_v0 }
  0xf3   : > { %1029 = vmatprep.mubr.msk.f32.mxu0 %vm1434_vm0, %v1433_v0 }
 0x132   : > { %v608_v10 = vpop.f32.mrf.mxu1 }
 0x134   : > { %v1026_v11 = vpop.f32.mrf.mxu1 }
 0x1b2   : > { %v532_v14 = vpop.f32.mrf.mxu0 }
 0x1b3   : > { %v609_v15 = vadd.f32 %v608_v10, %v532_v14 }
 0x1b4   : > { %v1021_v16 = vpop.f32.mrf.mxu0 }
 0x1b5   : > { %v612_v17 = vsub.f32 0.0, %v609_v15 }
 0x1b7   : > { %v613_v18 = vmul.f32 1.442695, %v612_v17 }
 0x1b9   : > { %1192 = vpow2.f32 %v613_v18 }
 0x1c6   : > { %v1193_v19 = vpop.eup %1192 }
 0x1c7   : > { %v616_v20 = vmul.f32 %v1193_v19, %v1193_v19  ;;  %v615_v22 = vsub.f32 1.0, %v1193_v19 }
 0x1c9   : > { %v617_v21 = vadd.f32 1.0, %v616_v20 }
 0x1cb   : > { %1194 = vrcp.f32 %v617_v21 }
 0x1d8   : > { %v1195_v23 = vpop.eup %1194 }
 0x1d9   : > { %v619_v24 = vmul.f32 %v1195_v23, %v615_v22 }
 0x1db   : > { %1028 = vmatpush3.msk.msra.mxu0 %vm463_vm1, %v619_v24 }
 0x1dc   : > { %1030 = vmatmul.mubr.msk.f32.vlgmr.msra.gmra.mxu0 %vm459_vm2, %v620_v25 }
 0x29c   : > { %v699_v27 = vpop.f32.mrf.mxu0 }
 0x29d   : > { %v700_v28 = vadd.f32 %v699_v27, %v625_v26  ;;  %709 = sbr.rel (%p998_p1) target bundleno = 873 (0x369), region = 64 }
 0x29e   : > { %v1031_v29 = vpop.f32.mrf.mxu0 }
 0x29f   : > { %v704_v30 = vadd.f32 %v700_v28, %v458_v9 }
 0x2a1   : > { %705 = vst [vmem:[%s422_s24] sm:$0xf] %v704_v30 }
 0x2a2   : > { %v710_v31 = vld [vmem:[%s1903_s7] sm:$0xff]  ;;  %v1437_v33 = vmov 0.0   ;;  %vm1438_vm4 = vmmov 0   ;;  %v1439_v34 = vmov 0  }
 0x2a3   : > { %v711_v32 = vld [vmem:[%s1904_s5] sm:$0xff]  ;;  %1032 = vmatprep.subr.mxu0 %v1437_v33  ;;  %1034 = vmatprep.mubr.msk.f32.mxu0 %vm1438_vm4, %v1437_v33 }
 0x2a4   : > { %1033 = vmatpush3.msk.msra.mxu0 %vm463_vm1, %v619_v24  ;;  %1196 = vset.pattern.permute.xlu0 %v1439_v34 }
 0x2a5   : > { %1035 = vmatmul.mubr.msk.f32.vlgmr.msra.gmra.mxu0 %vm459_vm2, %v710_v31  ;;  %714 = vperm.xlu0 %1196, %v711_v32  }
 0x320   : > { %v715_v35 = vpop.permute.xlu0 %714 }
 0x365   : > { %v786_v36 = vpop.f32.mrf.mxu0 }
 0x366   : > { %v787_v37 = vadd.f32 %v786_v36, %v715_v35 }
 0x367   : > { %v1036_v38 = vpop.f32.mrf.mxu0 }
 0x368   : > { %790 = vst [vmem:[%s429_s27] sm:$0xff] %v787_v37 }
 0x369 PF: > { %s1906_s29 = sld [smem:[#allocation21_spill]]  ;;  %s1039_s15 = smul.u32 3, %s1417_s19 }
 0x36a   : > { %s812_s26 = sshll.u32 %s422_s24, 4  ;;  %s1004_s14 = sadd.s32 4294967295, %s1413_s18  ;;  %s1727_s26 = int_to_ptr.vmem [resolvable:$true] %s812_s26 }
 0x36b   : > { %s808_s23 = sadd.s32 %s1413_s18, %s1039_s15  ;;  %s1907_s9 = sld [smem:[#allocation35_spill]] }
 0x36c   : > { %s1003_s13 = sshll.u32 %s808_s23, 6  ;;  %p1735_p3 = scmp.gt.s32.totalorder %s1004_s14, 0 }
 0x36d   : > { %s792_s7 = scalar_lea.sflag [#allocation5], %s420_s2  ;;  %s1251_s24 = scalar_lea.vmem %s1727_s26, 64 }
 0x36e   : > { %p1252_p12 = scmp.ne.s32.totalorder %s1727_s26, %s1251_s24  ;;  %s1440_s28 = smov [#allocation8]  }
 0x36f   : > { %p1909_p7 = scmp.ne.s32.totalorder %s1906_s29, 0  ;;  %s1255_s30 = sshll.u32 %s1440_s28, 4  ;;  %s1256_s30 = int_to_ptr.vmem [resolvable:$false] %s1255_s30 }
 0x370   : > { %s1257_s5 = scalar_lea.vmem %s1256_s30, 128  ;;  %p1258_p5 = scmp.lt.s32.totalorder %s1727_s26, %s1256_s30 }
 0x371   : > { %s810_s25 = scalar_lea.hbm %s1907_s9, %s1003_s13  ;;  %p1253_p13 = pnand %p1252_p12, %p1909_p7 }
 0x372   : > { %p1259_p9 = scmp.lt.s32.totalorder %s1257_s5, %s1251_s24 }
 0x373   : > { %p1254_p0 = pneg %p1253_p13 }
 0x374   : > { %p1260_p4 = por %p1259_p9, %p1258_p5 }
 0x376   : > { %p1261_p6 = pnand %p1260_p4, %p1254_p0 }
 0x378   : > { %1264 = shalt.err (!%p1261_p6)
}
 0x379   : > { %s1265_s15 = scalar_lea.hbm %s810_s25, 64  ;;  %s1269_s23 = scalar_lea.hbm %s1907_s9, 384 }
 0x37a   : > { %p1266_p10 = scmp.ne.s32.totalorder %s810_s25, %s1265_s15  ;;  %p1270_p8 = scmp.lt.s32.totalorder %s810_s25, %s1907_s9 }
 0x37b   : > { %p1271_p1 = scmp.lt.s32.totalorder %s1269_s23, %s1265_s15 }
 0x37c   : > { %p1267_p11 = pnand %p1266_p10, %p1909_p7 }
 0x37d   : > { %p1272_p12 = por %p1271_p1, %p1270_p8 }
 0x37e   : > { %p1268_p2 = pneg %p1267_p11 }
 0x380   : > { %p1273_p13 = pnand %p1272_p12, %p1268_p2 }
 0x382   : > { %1276 = shalt.err (!%p1273_p13)
}
 0x383   : > { %s1910_s3 = sld [smem:[#allocation23_spill]]  ;;  %s1949_s14 = smov (!%p1735_p3, %s1004_s14), 0 }
 0x384   : > { %1046 = dma.vmem_to_hbm [thread:$0]  (%p1909_p7), %s1727_s26, 64, %s810_s25, %s792_s7  }
 0x385   : > { %s1005_s24 = sshll.u32 %s1417_s19, 1  ;;  %s830_s28 = sshll.u32 %s429_s27, 4  ;;  %s831_s28 = int_to_ptr.vmem [resolvable:$true] %s830_s28 }
 0x386   : > { %s826_s30 = sadd.s32 %s1005_s24, %s1949_s14  ;;  %s1911_s29 = sld [smem:[#allocation36_spill]] }
 0x387   : > { %s1006_s5 = sshll.u32 %s826_s30, 7  ;;  %s797_s23 = scalar_lea.sflag [#allocation10], %s427_s12 }
 0x388   : > { %s1277_s13 = scalar_lea.vmem %s831_s28, 128  ;;  %s1441_s18 = smov [#allocation9]  }
 0x389   : > { %p1278_p0 = scmp.ne.s32.totalorder %s831_s28, %s1277_s13  ;;  %p1912_p5 = scmp.ne.s32.totalorder %s1910_s3, 0 }
 0x38a   : > { %s1281_s26 = sshll.u32 %s1441_s18, 4  ;;  %s1282_s26 = int_to_ptr.vmem [resolvable:$false] %s1281_s26 }
 0x38b   : > { %p1279_p9 = pnand %p1278_p0, %p1912_p5  ;;  %s1283_s19 = scalar_lea.vmem %s1282_s26, 256 }
 0x38c   : > { %s828_s4 = scalar_lea.hbm %s1911_s29, %s1006_s5  ;;  %p1284_p3 = scmp.lt.s32.totalorder %s831_s28, %s1282_s26 }
 0x38d   : > { %p1280_p7 = pneg %p1279_p9  ;;  %p1285_p4 = scmp.lt.s32.totalorder %s1283_s19, %s1277_s13 }
 0x38f   : > { %p1286_p6 = por %p1285_p4, %p1284_p3 }
 0x391   : > { %p1287_p10 = pnand %p1286_p6, %p1280_p7 }
 0x393   : > { %1290 = shalt.err (!%p1287_p10)
}
 0x394   : > { %s1291_s6 = scalar_lea.hbm %s828_s4, 128  ;;  %s1295_s14 = scalar_lea.hbm %s1911_s29, 512 }
 0x395   : > { %p1292_p11 = scmp.ne.s32.totalorder %s828_s4, %s1291_s6  ;;  %p1296_p1 = scmp.lt.s32.totalorder %s828_s4, %s1911_s29 }
 0x396   : > { %p1297_p12 = scmp.lt.s32.totalorder %s1295_s14, %s1291_s6 }
 0x397   : > { %p1293_p2 = pnand %p1292_p11, %p1912_p5 }
 0x398   : > { %p1298_p13 = por %p1297_p12, %p1296_p1 }
 0x399   : > { %p1294_p8 = pneg %p1293_p2 }
 0x39b   : > { %p1299_p0 = pnand %p1298_p13, %p1294_p8 }
 0x39d   : > { %1302 = shalt.err (!%p1299_p0)
}
 0x39e   : > { %1047 = dma.vmem_to_hbm [thread:$0]  (%p1912_p5), %s831_s28, 128, %s828_s4, %s797_s23  }
 0x39f PF: > { %s1913_s7 = sld [smem:[#allocation16_spill]]  ;;  %p1068_p9 = scmp.ge.s32.totalorder %s1429_s22, 2 }
 0x3a0   : > { %s1914_s17 = sld [smem:[#allocation22_spill]] }
 0x3a5   : > { %s842_s24 = sand.u32 1, %s1913_s7  }
 0x3a6   : > { %p1915_p7 = scmp.ne.s32.totalorder %s1914_s17, 0  ;;  %s843_s30 = scalar_lea.sflag [#allocation5], %s842_s24 }
 0x3a8   : > { %p1059_p3 = pnand %p1068_p9, %p1915_p7 }
 0x3aa   : > { %p1060_p4 = pneg %p1059_p3 }
 0x3ac   : > { %1368 = dma.done.wait (%p1060_p4), %s843_s30, 64  }
 0x3ad   : > { %1370 = vsyncadd (%p1060_p4), %s843_s30, 4294967232  ;;  %s1916_s5 = sld [smem:[#allocation15_spill]] }
 0x3ae   : > { %s1917_s15 = sld [smem:[#allocation24_spill]] }
 0x3b3   : > { %s851_s2 = sand.u32 1, %s1916_s5  }
 0x3b4   : > { %p1918_p6 = scmp.ne.s32.totalorder %s1917_s15, 0  ;;  %s852_s3 = scalar_lea.sflag [#allocation10], %s851_s2 }
 0x3b6   : > { %p1062_p10 = pnand %p1068_p9, %p1918_p6 }
 0x3b8   : > { %p1063_p11 = pneg %p1062_p10 }
 0x3ba   : > { %1372 = dma.done.wait (%p1063_p11), %s852_s3, 128  }
 0x3bb   : > { %1374 = vsyncadd (%p1063_p11), %s852_s3, 4294967168  ;;  %s30_s22 = sadd.s32 1, %s1429_s22   ;;  %s1920_s12 = sld [smem:[#allocation17_spill]] }
 0x3bc   : > { %p1789_p5 = scmp.ge.s32.totalorder %s30_s22, 8   ;;  %s1921_s13 = sld [smem:[#allocation18_spill]] }
 0x3bd   : > { %s1922_s14 = sld [smem:[#allocation28_spill]]  ;;  %s1928_s30 = smov %s1381_s10 }
 0x3be   : > { %s1923_s4 = sld [smem:[#allocation19_spill]]  ;;  %s1929_s10 = smov %s1385_s11 }
 0x3bf   : > { %s1924_s17 = sld [smem:[#allocation27_spill]]  ;;  %s1930_s11 = smov %s1652_s20 }
 0x3c0   : > { %s1925_s18 = sld [smem:[#allocation20_spill]]  ;;  %s1931_s15 = smov %s1405_s16 }
 0x3c1   : > { %s1926_s23 = sld [smem:[#allocation25_spill]]  ;;  %s1933_s19 = smov %s1425_s21 }
 0x3c2   : > { %s1927_s26 = sld [smem:[#allocation26_spill]] }
 0x3c4   : > { %s1932_s16 = smov %s1923_s4  ;;  %29 = sbr.rel (!%p1789_p5) target bundleno = 22 (0x16), region = 125 }
 0x3c7   : > { %s1934_s20 = smov %s1926_s23 }
 0x3c8   : > { %s1935_s21 = smov %s1927_s26 }
 0x3c9   :  { %857 = vsyncpa [#allocation4], 1 }
 0x3ca   :  { %859 = vsyncpa [#allocation4 + $0x1], 1 }
 0x3cb   :  { %860 = vsyncpa [#allocation7], 1 }
 0x3cc   :  { %861 = vsyncpa [#allocation5], 1 }
 0x3cd   :  { %863 = vsyncpa [#allocation5 + $0x1], 1 }
 0x3ce   :  { %864 = vsyncpa [#allocation10], 1 }
 0x3cf   :  { %866 = vsyncpa [#allocation10 + $0x1], 1 }

</bundles_post_ra>
